<compile_context>
chip_gen: v7x
topology: tpu7x:2x2x1
jax: 0.10.0
libtpu: 0.0.40
codegen_flags: <defaults>
</compile_context>

<pallas_src>
import math

import jax
import jax.numpy as jnp
from jax.experimental import pallas as pl
from jax.experimental.pallas import tpu as pltpu

_LANE = 128


def _round_up(n, m):
    return ((n + m - 1) // m) * m


def _discriminator_kernel(xt_ref,
                          w1_ref,
                          w2_ref, b2_ref,
                          w3_ref, b3_ref,
                          w4_ref, b4_ref,
                          o_ref):
    # Layer 1: Linear(2, 256) + ReLU on the MXU.  Bias folded into w1 via the
    # ones row of xt (K padded 3 -> 4 for clean bf16 sublane packing).
    h1 = jnp.dot(w1_ref[...], xt_ref[...],
                 preferred_element_type=jnp.float32)      # (256, TB) f32
    h1 = jnp.maximum(h1, 0.0).astype(jnp.bfloat16)
    # Dropout(0.3): identity in eval mode.

    # Layer 2: Linear(256, 128) + ReLU on MXU, bf16 inputs / f32 accumulation.
    h2 = jnp.dot(w2_ref[...], h1,
                 preferred_element_type=jnp.float32) + b2_ref[...]
    h2 = jnp.maximum(h2, 0.0).astype(jnp.bfloat16)        # (128, TB)

    # Layer 3: Linear(128, 64) + ReLU on MXU.
    h3 = jnp.dot(w3_ref[...], h2,
                 preferred_element_type=jnp.float32) + b3_ref[...]
    h3 = jnp.maximum(h3, 0.0)                             # (64, TB) f32

    # Layer 4: Linear(64, 1) + Sigmoid.  N=1 -> sublane reduce (XLU), not MXU.
    logits = jnp.sum(h3 * w4_ref[...], axis=0, keepdims=True) + b4_ref[...]
    o_ref[...] = jax.nn.sigmoid(logits).astype(o_ref.dtype)   # (1, TB)


def discriminator_forward(x, params, *, tile_b=4096):
    """x: (B, 2) float32.  params: w1..w4 stored (in,out), b1..b4 stored (1,out).
    Returns (B, 1) float32 (same as the PyTorch module, eval-mode dropout)."""
    B = x.shape[0]

    # Batch tile: multiple of 128 lanes.  TB=4096 keeps intermediates
    # (h1 f32 4 MiB + bf16 copies + h2/h3 + double-buffered I/O, ~8 MiB peak)
    # well under the 32 MiB scoped VMEM on v5e/v6e/v7x.
    b128 = _round_up(B, _LANE)
    tb = min(tile_b, b128)
    # Keep >= 2 grid steps whenever the batch allows it so ("parallel",) can
    # shard tiles across v7x's two TensorCores (no-op on single-TC v5e/v6e).
    if b128 <= tb and b128 >= 2 * _LANE:
        tb = _round_up((b128 + 1) // 2, _LANE)
    b_pad = _round_up(B, tb)
    grid = (b_pad // tb,)

    # One-time wrapper-side layout transform (feature-major, batch on lanes):
    # rows = [x0, x1, 1(bias), 0(pad)], padded batch columns are zero.
    x_bf = x.astype(jnp.bfloat16)
    aug = jnp.concatenate(
        [x_bf, jnp.ones((B, 1), jnp.bfloat16), jnp.zeros((B, 1), jnp.bfloat16)],
        axis=1)                                            # (B, 4)
    xt = jnp.pad(aug, ((0, b_pad - B), (0, 0))).T          # (4, b_pad) bf16

    # Weights: bias folded into layer-1, tiny weights stay VMEM-resident.
    w1_aug = jnp.concatenate(
        [params["w1"].T, params["b1"].T, jnp.zeros((256, 1), jnp.float32)],
        axis=1).astype(jnp.bfloat16)                       # (256, 4)
    w2_t = params["w2"].T.astype(jnp.bfloat16)             # (128, 256)
    b2_t = params["b2"].T.astype(jnp.float32)              # (128, 1)
    w3_t = params["w3"].T.astype(jnp.bfloat16)             # (64, 128)
    b3_t = params["b3"].T.astype(jnp.float32)              # (64, 1)
    w4_t = params["w4"].astype(jnp.float32)                # (64, 1)
    b4_t = params["b4"].T.astype(jnp.float32)              # (1, 1)

    const = lambda i: (0, 0)     # weights/biases: VMEM-resident all iterations
    batch = lambda i: (0, i)     # x / out: walk the batch (lane) axis

    in_specs = [
        pl.BlockSpec((4, tb), batch),
        pl.BlockSpec(w1_aug.shape, const),
        pl.BlockSpec(w2_t.shape, const),
        pl.BlockSpec(b2_t.shape, const),
        pl.BlockSpec(w3_t.shape, const),
        pl.BlockSpec(b3_t.shape, const),
        pl.BlockSpec(w4_t.shape, const),
        pl.BlockSpec(b4_t.shape, const),
    ]
    out_spec = pl.BlockSpec((1, tb), batch)

    weight_bytes = sum(int(a.size) * a.dtype.itemsize
                       for a in (w1_aug, w2_t, b2_t, w3_t, b3_t, w4_t, b4_t))
    cost = pl.CostEstimate(
        flops=2 * b_pad * (4 * 256 + 256 * 128 + 128 * 64 + 64),
        transcendentals=b_pad,                              # sigmoid
        bytes_accessed=int(xt.size) * 2 + weight_bytes + b_pad * 4,
    )

    out = pl.pallas_call(
        _discriminator_kernel,
        out_shape=jax.ShapeDtypeStruct((1, b_pad), jnp.float32),
        grid=grid,
        in_specs=in_specs,
        out_specs=out_spec,
        compiler_params=pltpu.CompilerParams(
            dimension_semantics=("parallel",),      # shard batch tiles across TCs
            vmem_limit_bytes=32 * 1024 * 1024,      # safe on v5e/v6e/v7x
        ),
        cost_estimate=cost,
    )(xt, w1_aug, w2_t, b2_t, w3_t, b3_t, w4_t, b4_t)

    return out[0, :B].reshape(B, 1)


def init_params(key):
    """Mirror PyTorch nn.Linear default init:
    uniform(-1/sqrt(fan_in), 1/sqrt(fan_in)) for weight and bias."""
    dims = [(2, 256), (256, 128), (128, 64), (64, 1)]
    params = {}
    keys = jax.random.split(key, 2 * len(dims))
    for i, (fan_in, fan_out) in enumerate(dims):
        bound = 1.0 / math.sqrt(fan_in)
        params[f"w{i + 1}"] = jax.random.uniform(
            keys[2 * i], (fan_in, fan_out),
            minval=-bound, maxval=bound, dtype=jnp.float32)
        params[f"b{i + 1}"] = jax.random.uniform(
            keys[2 * i + 1], (1, fan_out),
            minval=-bound, maxval=bound, dtype=jnp.float32)
    return params


def reference_forward(x, params):
    """Pure-JAX f32 reference (eval-mode dropout = identity)."""
    h = x
    for i in range(1, 4):
        h = jnp.maximum(h @ params[f"w{i}"] + params[f"b{i}"], 0.0)
    return jax.nn.sigmoid(h @ params["w4"] + params["b4"])


if __name__ == "__main__":
    key = jax.random.PRNGKey(0)
    k_x, k_x2, k_p = jax.random.split(key, 3)
    params = init_params(k_p)

    # Small case (single 128-lane tile, one grid step).
    B = 8
    x = jax.random.normal(k_x, (B, 2), dtype=jnp.float32)
    out = jax.block_until_ready(discriminator_forward(x, params))
    ref = reference_forward(x, params)
    assert out.shape == (B, 1)
    # bf16 MXU inputs (f32 accumulate) vs f32 reference -> loose tolerance.
    assert jnp.allclose(out, ref, atol=3e-2, rtol=0.0), float(jnp.max(jnp.abs(out - ref)))

    # Non-multiple-of-128 batch: exercises padding + the >=2-grid-step heuristic.
    B2 = 300
    x2 = jax.random.normal(k_x2, (B2, 2), dtype=jnp.float32)
    out2 = jax.block_until_ready(discriminator_forward(x2, params))
    ref2 = reference_forward(x2, params)
    assert out2.shape == (B2, 1)
    assert jnp.allclose(out2, ref2, atol=3e-2, rtol=0.0), float(jnp.max(jnp.abs(out2 - ref2)))

    print("KERNEL_OK")
</pallas_src>

<mosaic_0001>
module attributes {stable_mosaic.version = 11 : i64} {
  func.func @_discriminator_kernel(%arg0: i32, %arg1: memref<4x128xbf16, #tpu.memory_space<vmem>>, %arg2: memref<256x4xbf16, #tpu.memory_space<vmem>>, %arg3: memref<128x256xbf16, #tpu.memory_space<vmem>>, %arg4: memref<128x1xf32, #tpu.memory_space<vmem>>, %arg5: memref<64x128xbf16, #tpu.memory_space<vmem>>, %arg6: memref<64x1xf32, #tpu.memory_space<vmem>>, %arg7: memref<64x1xf32, #tpu.memory_space<vmem>>, %arg8: memref<1x1xf32, #tpu.memory_space<vmem>>, %arg9: memref<1x128xf32, #tpu.memory_space<vmem>>) attributes {dimension_semantics = [#tpu.dimension_semantics<parallel>], iteration_bounds = array<i64: 1>, scalar_prefetch = 0 : i64, scratch_operands = 0 : i64, tpu.core_type = #tpu.core_type<tc>, window_params = [{transform_indices = @transform_0, window_bounds = array<i64: 4, 128>}, {pipeline_mode = #tpu.pipeline_mode<synchronous>, transform_indices = @transform_1, window_bounds = array<i64: 256, 4>}, {pipeline_mode = #tpu.pipeline_mode<synchronous>, transform_indices = @transform_2, window_bounds = array<i64: 128, 256>}, {pipeline_mode = #tpu.pipeline_mode<synchronous>, transform_indices = @transform_3, window_bounds = array<i64: 128, 1>}, {pipeline_mode = #tpu.pipeline_mode<synchronous>, transform_indices = @transform_4, window_bounds = array<i64: 64, 128>}, {pipeline_mode = #tpu.pipeline_mode<synchronous>, transform_indices = @transform_5, window_bounds = array<i64: 64, 1>}, {pipeline_mode = #tpu.pipeline_mode<synchronous>, transform_indices = @transform_6, window_bounds = array<i64: 64, 1>}, {pipeline_mode = #tpu.pipeline_mode<synchronous>, transform_indices = @transform_7, window_bounds = array<i64: 1, 1>}, {transform_indices = @transform_8, window_bounds = array<i64: 1, 128>}]} {
    %c0 = arith.constant 0 : index
    %c0_0 = arith.constant 0 : index
    %0 = vector.load %arg2[%c0, %c0_0] : memref<256x4xbf16, #tpu.memory_space<vmem>>, vector<256x4xbf16>
    %c0_1 = arith.constant 0 : index
    %c0_2 = arith.constant 0 : index
    %1 = vector.load %arg1[%c0_1, %c0_2] : memref<4x128xbf16, #tpu.memory_space<vmem>>, vector<4x128xbf16>
    %cst = arith.constant dense<0.000000e+00> : vector<256x128xf32>
    %2 = tpu.matmul %0, %1, %cst {dimension_numbers = #tpu.dot_dimension_numbers<[1], [0], [0], [1], [0, 0, 1, 1], [], []>} : vector<256x4xbf16>, vector<4x128xbf16>, vector<256x128xf32> -> vector<256x128xf32>
    %cst_3 = arith.constant 0.000000e+00 : f32
    %3 = vector.broadcast %cst_3 : f32 to vector<256x128xf32>
    %4 = arith.maximumf %2, %3 : vector<256x128xf32>
    %5 = arith.truncf %4 : vector<256x128xf32> to vector<256x128xbf16>
    %c0_4 = arith.constant 0 : index
    %c0_5 = arith.constant 0 : index
    %6 = vector.load %arg3[%c0_4, %c0_5] : memref<128x256xbf16, #tpu.memory_space<vmem>>, vector<128x256xbf16>
    %cst_6 = arith.constant dense<0.000000e+00> : vector<128x128xf32>
    %7 = tpu.matmul %6, %5, %cst_6 {dimension_numbers = #tpu.dot_dimension_numbers<[1], [0], [0], [1], [0, 0, 1, 1], [], []>} : vector<128x256xbf16>, vector<256x128xbf16>, vector<128x128xf32> -> vector<128x128xf32>
    %c0_7 = arith.constant 0 : index
    %c0_8 = arith.constant 0 : index
    %8 = vector.load %arg4[%c0_7, %c0_8] : memref<128x1xf32, #tpu.memory_space<vmem>>, vector<128x1xf32>
    %9 = vector.broadcast %8 : vector<128x1xf32> to vector<128x128xf32>
    %10 = arith.addf %7, %9 : vector<128x128xf32>
    %cst_9 = arith.constant 0.000000e+00 : f32
    %11 = vector.broadcast %cst_9 : f32 to vector<128x128xf32>
    %12 = arith.maximumf %10, %11 : vector<128x128xf32>
    %13 = arith.truncf %12 : vector<128x128xf32> to vector<128x128xbf16>
    %c0_10 = arith.constant 0 : index
    %c0_11 = arith.constant 0 : index
    %14 = vector.load %arg5[%c0_10, %c0_11] : memref<64x128xbf16, #tpu.memory_space<vmem>>, vector<64x128xbf16>
    %cst_12 = arith.constant dense<0.000000e+00> : vector<64x128xf32>
    %15 = tpu.matmul %14, %13, %cst_12 {dimension_numbers = #tpu.dot_dimension_numbers<[1], [0], [0], [1], [0, 0, 1, 1], [], []>} : vector<64x128xbf16>, vector<128x128xbf16>, vector<64x128xf32> -> vector<64x128xf32>
    %c0_13 = arith.constant 0 : index
    %c0_14 = arith.constant 0 : index
    %16 = vector.load %arg6[%c0_13, %c0_14] : memref<64x1xf32, #tpu.memory_space<vmem>>, vector<64x1xf32>
    %17 = vector.broadcast %16 : vector<64x1xf32> to vector<64x128xf32>
    %18 = arith.addf %15, %17 : vector<64x128xf32>
    %cst_15 = arith.constant 0.000000e+00 : f32
    %19 = vector.broadcast %cst_15 : f32 to vector<64x128xf32>
    %20 = arith.maximumf %18, %19 : vector<64x128xf32>
    %c0_16 = arith.constant 0 : index
    %c0_17 = arith.constant 0 : index
    %21 = vector.load %arg7[%c0_16, %c0_17] : memref<64x1xf32, #tpu.memory_space<vmem>>, vector<64x1xf32>
    %22 = vector.broadcast %21 : vector<64x1xf32> to vector<64x128xf32>
    %23 = arith.mulf %20, %22 : vector<64x128xf32>
    %cst_18 = arith.constant dense<0.000000e+00> : vector<128xf32>
    %24 = vector.multi_reduction <add>, %23, %cst_18 [0] : vector<64x128xf32> to vector<128xf32>
    %25 = vector.shape_cast %24 : vector<128xf32> to vector<1x128xf32>
    %c0_19 = arith.constant 0 : index
    %c0_20 = arith.constant 0 : index
    %26 = vector.load %arg8[%c0_19, %c0_20] : memref<1x1xf32, #tpu.memory_space<vmem>>, vector<1x1xf32>
    %27 = vector.broadcast %26 : vector<1x1xf32> to vector<1x128xf32>
    %28 = arith.addf %25, %27 : vector<1x128xf32>
    %29 = arith.negf %28 : vector<1x128xf32>
    %30 = math.exp %29 : vector<1x128xf32>
    %cst_21 = arith.constant 1.000000e+00 : f32
    %31 = vector.broadcast %cst_21 : f32 to vector<1x128xf32>
    %32 = arith.addf %31, %30 : vector<1x128xf32>
    %33 = arith.divf %31, %32 : vector<1x128xf32>
    %c0_22 = arith.constant 0 : index
    %c0_23 = arith.constant 0 : index
    %34 = vector.load %arg9[%c0_22, %c0_23] : memref<1x128xf32, #tpu.memory_space<vmem>>, vector<1x128xf32>
    tpu.vector_store %arg9[%c0_22, %c0_23], %33 {strides = array<i32>} : memref<1x128xf32, #tpu.memory_space<vmem>>, vector<1x128xf32>,
    return
  }
  func.func @transform_0(%arg0: i32) -> (i32, i32) {
    %c0_i32 = arith.constant 0 : i32
    %c0_i32_0 = arith.constant 0 : i32
    return %c0_i32, %arg0 : i32, i32
  }
  func.func @transform_1(%arg0: i32) -> (i32, i32) {
    %c0_i32 = arith.constant 0 : i32
    %c0_i32_0 = arith.constant 0 : i32
    %c0_i32_1 = arith.constant 0 : i32
    return %c0_i32, %c0_i32_0 : i32, i32
  }
  func.func @transform_2(%arg0: i32) -> (i32, i32) {
    %c0_i32 = arith.constant 0 : i32
    %c0_i32_0 = arith.constant 0 : i32
    %c0_i32_1 = arith.constant 0 : i32
    return %c0_i32, %c0_i32_0 : i32, i32
  }
  func.func @transform_3(%arg0: i32) -> (i32, i32) {
    %c0_i32 = arith.constant 0 : i32
    %c0_i32_0 = arith.constant 0 : i32
    %c0_i32_1 = arith.constant 0 : i32
    return %c0_i32, %c0_i32_0 : i32, i32
  }
  func.func @transform_4(%arg0: i32) -> (i32, i32) {
    %c0_i32 = arith.constant 0 : i32
    %c0_i32_0 = arith.constant 0 : i32
    %c0_i32_1 = arith.constant 0 : i32
    return %c0_i32, %c0_i32_0 : i32, i32
  }
  func.func @transform_5(%arg0: i32) -> (i32, i32) {
    %c0_i32 = arith.constant 0 : i32
    %c0_i32_0 = arith.constant 0 : i32
    %c0_i32_1 = arith.constant 0 : i32
    return %c0_i32, %c0_i32_0 : i32, i32
  }
  func.func @transform_6(%arg0: i32) -> (i32, i32) {
    %c0_i32 = arith.constant 0 : i32
    %c0_i32_0 = arith.constant 0 : i32
    %c0_i32_1 = arith.constant 0 : i32
    return %c0_i32, %c0_i32_0 : i32, i32
  }
  func.func @transform_7(%arg0: i32) -> (i32, i32) {
    %c0_i32 = arith.constant 0 : i32
    %c0_i32_0 = arith.constant 0 : i32
    %c0_i32_1 = arith.constant 0 : i32
    return %c0_i32, %c0_i32_0 : i32, i32
  }
  func.func @transform_8(%arg0: i32) -> (i32, i32) {
    %c0_i32 = arith.constant 0 : i32
    %c0_i32_0 = arith.constant 0 : i32
    return %c0_i32, %arg0 : i32, i32
  }
}

</mosaic_0001>

<bundles_post_ra>
// kernel: tpu_custom_call.1
= control target key start
LH: loop header
LB: loop body
LE: loop exit
PB: predicated region body
PF: predicated region fallthrough
CT: control target
= control target key end

     0   :  { %s1562_s0 = inlined_call_operand.vmem [shape: bf16[4,128], index: 0, kind: input, shape index: {}]   ;;  %s1563_s1 = inlined_call_operand.vmem [shape: bf16[256,4], index: 1, kind: input, shape index: {}]   ;;  %s1564_s2 = inlined_call_operand.vmem [shape: bf16[128,256], index: 2, kind: input, shape index: {}]   ;;  %s1565_s3 = inlined_call_operand.vmem [shape: f32[128,1], index: 3, kind: input, shape index: {}]   ;;  %s1566_s4 = inlined_call_operand.vmem [shape: bf16[64,128], index: 4, kind: input, shape index: {}]   ;;  %s1567_s5 = inlined_call_operand.vmem [shape: f32[64,1], index: 5, kind: input, shape index: {}]   ;;  %s1568_s6 = inlined_call_operand.vmem [shape: f32[64,1], index: 6, kind: input, shape index: {}]   ;;  %s1569_s7 = inlined_call_operand.<no memory space> [shape: f32[1,1], index: 7, kind: input, shape index: {}]   ;;  %s1570_s8 = inlined_call_operand.hbm [shape: f32[1,128], index: 8, kind: output, shape index: {}]  }
   0x1   :  { %v13_v0 = vstv %s1569_s7 }
   0x2   :  { %14 = vst [vmem:[#allocation2] sm:$0x1] %v13_v0 }
   0x3   :  { %v65_v1 = vld [vmem:[%s1562_s0] sm:$0x3]  ;;  %vm195_vm0 = vcmask 1041408   ;;  %vm146_vm1 = vcmask 31744   ;;  %v1185_v4 = vld [vmem:[%s1563_s1 + $0x8] sm:$0xff]   ;;  %v1186_v5 = vld [vmem:[%s1563_s1 + $0x10] sm:$0xff]  }
   0x4   :  { %v1184_v2 = vld [vmem:[%s1563_s1] sm:$0xff]   ;;  %1179 = vmatprep.subr.msk.bf16.mxu0 %vm195_vm0, %v65_v1  ;;  %v197_v3 = vsel %vm195_vm0, %v65_v1, 0  ;;  %v1187_v6 = vld [vmem:[%s1563_s1 + $0x18] sm:$0xff]   ;;  %v1189_v8 = vld [vmem:[%s1563_s1 + $0x28] sm:$0xff]  }
   0x5   :  { %1122 = vmatpush3.bf16.msra.mxu0 %v197_v3  ;;  %1123 = vmatprep.mubr.msk.bf16.mxu0 %vm146_vm1, %v1184_v2  ;;  %v1188_v7 = vld [vmem:[%s1563_s1 + $0x20] sm:$0xff]   ;;  %v1190_v9 = vld [vmem:[%s1563_s1 + $0x30] sm:$0xff]  }
   0x8   :  { %1124 = vmatmul.mubr.msk.bf16.vlgmr.msra.gmra.mrb[0].mxu0 %vm146_vm1, %v1185_v4 }
   0x9   :  { %1127 = vmatprep.mubr.msk.bf16.mxu0 %vm146_vm1, %v1186_v5 }
  0x10   :  { %1128 = vmatmul.mubr.msk.bf16.gmra.mrb[4].mxu0 %vm146_vm1, %v1187_v6 }
  0x11   :  { %1131 = vmatprep.mubr.msk.bf16.mxu0 %vm146_vm1, %v1188_v7 }
  0x18   :  { %1132 = vmatmul.mubr.msk.bf16.gmra.mrb[8].mxu0 %vm146_vm1, %v1189_v8 }
  0x19   :  { %1135 = vmatprep.mubr.msk.bf16.mxu0 %vm146_vm1, %v1190_v9 }
  0x1a   :  { %15 = vsyncpa [#allocation4], 0  ;;  %v1191_v10 = vld [vmem:[%s1563_s1 + $0x38] sm:$0xff]   ;;  %v1192_v11 = vld [vmem:[%s1563_s1 + $0x40] sm:$0xff]   ;;  %v1256_v21 = vmov 0  }
  0x1b   :  { %v1193_v12 = vld [vmem:[%s1563_s1 + $0x48] sm:$0xff]   ;;  %v1194_v13 = vld [vmem:[%s1563_s1 + $0x50] sm:$0xff]   ;;  %v1195_v14 = vld [vmem:[%s1563_s1 + $0x58] sm:$0xff]   ;;  %1182 = vset.pattern.permute.xlu0 %v1256_v21  ;;  %1183 = vset.pattern.permute.xlu1 %v1256_v21 }
  0x1c   :  { %v1196_v15 = vld [vmem:[%s1563_s1 + $0x60] sm:$0xff]   ;;  %v1197_v16 = vld [vmem:[%s1563_s1 + $0x68] sm:$0xff]   ;;  %v1198_v17 = vld [vmem:[%s1563_s1 + $0x70] sm:$0xff]  }
  0x1d   :  { %v1199_v18 = vld [vmem:[%s1563_s1 + $0x78] sm:$0xff]   ;;  %v1202_v19 = vld [vmem:[%s1564_s2 + $0x4] ss:$8 sps:$4 sm:$0xff]   ;;  %v426_v24 = vld [vmem:[%s1565_s3 + $0x10] sm:$0xff] }
  0x1e   :  { %632 = vmatprep.mubr.bf16.mxu1 %v1202_v19  ;;  %v424_v20 = vld [vmem:[%s1565_s3] sm:$0xff]  ;;  %v425_v22 = vld [vmem:[%s1565_s3 + $0x8] sm:$0xff]  ;;  %v430_v25 = vld [vmem:[%s1565_s3 + $0x30] sm:$0xff]  ;;  %452 = vperm.xlu1 %1183, %v426_v24  }
  0x1f   :  { %442 = vperm.xlu0 %1182, %v424_v20   ;;  %v428_v23 = vld [vmem:[%s1565_s3 + $0x20] sm:$0xff]  ;;  %v427_v26 = vld [vmem:[%s1565_s3 + $0x18] sm:$0xff]  ;;  %v429_v28 = vld [vmem:[%s1565_s3 + $0x28] sm:$0xff] }
  0x20   :  { %1136 = vmatmul.mubr.msk.bf16.gmra.mrb[12].mxu0 %vm146_vm1, %v1191_v10  ;;  %v432_v27 = vld [vmem:[%s1565_s3 + $0x40] sm:$0xff]  ;;  %v434_v29 = vld [vmem:[%s1565_s3 + $0x50] sm:$0xff]  ;;  %v431_v30 = vld [vmem:[%s1565_s3 + $0x38] sm:$0xff] }
  0x21   :  { %1139 = vmatprep.mubr.msk.bf16.mxu0 %vm146_vm1, %v1192_v11  ;;  %v436_v31 = vld [vmem:[%s1565_s3 + $0x60] sm:$0xff]  ;;  %v433_v32 = vld [vmem:[%s1565_s3 + $0x48] sm:$0xff]  ;;  %v438_v33 = vld [vmem:[%s1565_s3 + $0x70] sm:$0xff] }
  0x22   :  { %457 = vperm.xlu1 %1183, %v427_v26   ;;  %v435_v34 = vld [vmem:[%s1565_s3 + $0x58] sm:$0xff]  ;;  %v729_v35 = vld [vmem:[%s1567_s5] sm:$0xff]  ;;  %v437_v37 = vld [vmem:[%s1565_s3 + $0x68] sm:$0xff] }
  0x23   :  { %447 = vperm.xlu0 %1182, %v425_v22   ;;  %v731_v38 = vld [vmem:[%s1567_s5 + $0x10] sm:$0xff]  ;;  %v439_v41 = vld [vmem:[%s1565_s3 + $0x78] sm:$0xff]  ;;  %v874_v42 = vld [vmem:[%s1568_s6] sm:$0xff] }
  0x24   :  { %v730_v50 = vld [vmem:[%s1567_s5 + $0x8] sm:$0xff]  ;;  %v733_v51 = vld [vmem:[%s1567_s5 + $0x20] sm:$0xff]  ;;  %v732_v55 = vld [vmem:[%s1567_s5 + $0x18] sm:$0xff] }
  0x25   :  { %v734_v56 = vld [vmem:[%s1567_s5 + $0x28] sm:$0xff]  ;;  %v735_v1 = vld [vmem:[%s1567_s5 + $0x30] sm:$0xff]  ;;  %v736_v6 = vld [vmem:[%s1567_s5 + $0x38] sm:$0xff] }
  0x26   :  { %467 = vperm.xlu1 %1183, %v429_v28   ;;  %v875_v0 = vld [vmem:[%s1568_s6 + $0x8] sm:$0xff]  ;;  %v876_v5 = vld [vmem:[%s1568_s6 + $0x10] sm:$0xff]  ;;  %v878_v19 = vld [vmem:[%s1568_s6 + $0x20] sm:$0xff] }
  0x27   :  { %462 = vperm.xlu0 %1182, %v428_v23   ;;  %v943_v20 = vld [vmem:[#allocation2] sm:$0x1]  ;;  %v879_v28 = vld [vmem:[%s1568_s6 + $0x28] sm:$0xff] }
  0x28   :  { %1140 = vmatmul.mubr.msk.bf16.gmra.mrb[16].mxu0 %vm146_vm1, %v1193_v12 }
  0x29   :  { %1143 = vmatprep.mubr.msk.bf16.mxu0 %vm146_vm1, %v1194_v13 }
  0x2a   :  { %477 = vperm.xlu1 %1183, %v431_v30  }
  0x2b   :  { %472 = vperm.xlu0 %1182, %v430_v25  }
  0x2e   :  { %487 = vperm.xlu1 %1183, %v433_v32   ;;  %v881_v32 = vld [vmem:[%s1568_s6 + $0x38] sm:$0xff] }
  0x2f   :  { %482 = vperm.xlu0 %1182, %v432_v27  }
  0x30   :  { %1144 = vmatmul.mubr.msk.bf16.gmra.mrb[20].mxu0 %vm146_vm1, %v1195_v14  ;;  %v877_v14 = vld [vmem:[%s1568_s6 + $0x18] sm:$0xff] }
  0x31   :  { %1147 = vmatprep.mubr.msk.bf16.mxu0 %vm146_vm1, %v1196_v15  ;;  %v880_v15 = vld [vmem:[%s1568_s6 + $0x30] sm:$0xff] }
  0x32   :  { %497 = vperm.xlu1 %1183, %v435_v34  }
  0x33   :  { %492 = vperm.xlu0 %1182, %v434_v29  }
  0x36   :  { %507 = vperm.xlu1 %1183, %v437_v37  }
  0x37   :  { %502 = vperm.xlu0 %1182, %v436_v31  }
  0x38   :  { %1148 = vmatmul.mubr.msk.bf16.gmra.mrb[24].mxu0 %vm146_vm1, %v1197_v16 }
  0x39   :  { %1151 = vmatprep.mubr.msk.bf16.mxu0 %vm146_vm1, %v1198_v17 }
  0x3a   :  { %517 = vperm.xlu1 %1183, %v439_v41  }
  0x3b   :  { %512 = vperm.xlu0 %1182, %v438_v33  }
  0x3e   :  { %744 = vperm.xlu1 %1183, %v730_v50  }
  0x3f   :  { %739 = vperm.xlu0 %1182, %v729_v35  }
  0x40   :  { %1152 = vmatmul.mubr.msk.bf16.gmra.mrb[28].mxu0 %vm146_vm1, %v1199_v18 }
  0x42   :  { %754 = vperm.xlu1 %1183, %v732_v55  }
  0x43   :  { %749 = vperm.xlu0 %1182, %v731_v38  }
  0x46   :  { %889 = vperm.xlu1 %1183, %v875_v0  }
  0x47   :  { %884 = vperm.xlu0 %1182, %v874_v42  }
  0x4a   :  { %894 = vperm.xlu1 %1183, %v876_v5  }
  0x4b   :  { %759 = vperm.xlu0 %1182, %v733_v51  }
  0x4e   :  { %899 = vperm.xlu1 %1183, %v877_v14   ;;  %v1214_v14 = vld [vmem:[%s1564_s2 + $0x40] ss:$8 sps:$4 sm:$0xff]  }
  0x4f   :  { %764 = vperm.xlu0 %1182, %v734_v56  }
  0x52   :  { %904 = vperm.xlu1 %1183, %v878_v19   ;;  %v1221_v19 = vld [vmem:[%s1564_s2 + $0x74] ss:$8 sps:$4 sm:$0xff]  }
  0x53   :  { %769 = vperm.xlu0 %1182, %v735_v1  }
  0x56   :  { %909 = vperm.xlu1 %1183, %v879_v28  }
  0x57   :  { %774 = vperm.xlu0 %1182, %v736_v6  }
  0x5a   :  { %919 = vperm.xlu1 %1183, %v881_v32  }
  0x5b   :  { %914 = vperm.xlu0 %1182, %v880_v15   ;;  %v1215_v15 = vld [vmem:[%s1564_s2 + $0x54] ss:$8 sps:$4 sm:$0xff]  }
  0x5f   :  { %946 = vperm.xlu0 %1182, %v943_v20   ;;  %v1223_v20 = vld [vmem:[%s1564_s2 + $0x70] ss:$8 sps:$4 sm:$0xff]  }
  0x9d   :  { %v453_v32 = vpop.permute.xlu1 %452 }
  0xdb   :  { %v1125_v36 = vpop.f32.mrb[0].mxu0 }
  0xdc   :  { %v233_v39 = vpop.f32.mrb[1].mxu0  ;;  %v362_v43 = vmax.f32 %v1125_v36, 0.0 }
  0xdd   :  { %v1126_v40 = vpop.f32.mrb[2].mxu0  ;;  %v360_v46 = vmax.f32 %v233_v39, 0.0 }
  0xde   :  { %v363_v44 = vmax.f32 %v1126_v40, 0.0  ;;  %v236_v45 = vpop.f32.mrb[3].mxu0 }
  0xdf   :  { %v361_v47 = vmax.f32 %v236_v45, 0.0 }
  0xe0   :  { %v1433_v48 = vpack.c.bf16 %v363_v44, %v362_v43 }
  0xe1   :  { %v1435_v49 = vpack.c.bf16 %v361_v47, %v360_v46 }
  0xe3   :  { %v1129_v52 = vpop.f32.mrb[4].mxu0 }
  0xe4   :  { %v249_v53 = vpop.f32.mrb[5].mxu0  ;;  %v366_v57 = vmax.f32 %v1129_v52, 0.0 }
  0xe5   :  { %v1130_v54 = vpop.f32.mrb[6].mxu0  ;;  %v364_v60 = vmax.f32 %v249_v53, 0.0 }
  0xe6   :  { %v367_v58 = vmax.f32 %v1130_v54, 0.0  ;;  %v252_v59 = vpop.f32.mrb[7].mxu0 }
  0xe7   :  { %v365_v61 = vmax.f32 %v252_v59, 0.0 }
  0xe8   :  { %v1449_v62 = vpack.c.bf16 %v367_v58, %v366_v57 }
  0xe9   :  { %v1451_v63 = vpack.c.bf16 %v365_v61, %v364_v60 }
  0xeb   :  { %v1133_v2 = vpop.f32.mrb[8].mxu0 }
  0xec   :  { %v265_v3 = vpop.f32.mrb[9].mxu0  ;;  %v370_v7 = vmax.f32 %v1133_v2, 0.0 }
  0xed   :  { %v1134_v4 = vpop.f32.mrb[10].mxu0  ;;  %v368_v10 = vmax.f32 %v265_v3, 0.0 }
  0xee   :  { %v371_v8 = vmax.f32 %v1134_v4, 0.0  ;;  %v268_v9 = vpop.f32.mrb[11].mxu0 }
  0xef   :  { %v369_v11 = vmax.f32 %v268_v9, 0.0  ;;  %v1206_v9 = vld [vmem:[%s1564_s2 + $0x24] ss:$8 sps:$4 sm:$0xff]  }
  0xf0   :  { %v1465_v12 = vpack.c.bf16 %v371_v8, %v370_v7  ;;  %v1203_v7 = vld [vmem:[%s1564_s2 + $0x14] ss:$8 sps:$4 sm:$0xff]   ;;  %v1205_v8 = vld [vmem:[%s1564_s2 + $0x10] ss:$8 sps:$4 sm:$0xff]  }
  0xf1   :  { %v1467_v13 = vpack.c.bf16 %v369_v11, %v368_v10  ;;  %v1208_v10 = vld [vmem:[%s1564_s2 + $0x20] ss:$8 sps:$4 sm:$0xff]   ;;  %v1209_v11 = vld [vmem:[%s1564_s2 + $0x34] ss:$8 sps:$4 sm:$0xff]  }
  0xf3   :  { %v1137_v16 = vpop.f32.mrb[12].mxu0 }
  0xf4   :  { %v281_v17 = vpop.f32.mrb[13].mxu0  ;;  %v374_v21 = vmax.f32 %v1137_v16, 0.0  ;;  %v1217_v16 = vld [vmem:[%s1564_s2 + $0x50] ss:$8 sps:$4 sm:$0xff]  }
  0xf5   :  { %v1138_v18 = vpop.f32.mrb[14].mxu0  ;;  %v372_v24 = vmax.f32 %v281_v17, 0.0  ;;  %v1218_v17 = vld [vmem:[%s1564_s2 + $0x64] ss:$8 sps:$4 sm:$0xff]  }
  0xf6   :  { %v375_v22 = vmax.f32 %v1138_v18, 0.0  ;;  %v284_v23 = vpop.f32.mrb[15].mxu0  ;;  %v1220_v18 = vld [vmem:[%s1564_s2 + $0x60] ss:$8 sps:$4 sm:$0xff]  }
  0xf7   :  { %v373_v25 = vmax.f32 %v284_v23, 0.0 }
  0xf8   :  { %v1478_v26 = vpack.c.bf16 %v375_v22, %v374_v21  ;;  %v1224_v21 = vld [vmem:[%s1566_s4] sm:$0xff]   ;;  %v443_v22 = vpop.permute.xlu0 %442 }
  0xf9   :  { %v398_v27 = vpack.c.bf16 %v373_v25, %v372_v24  ;;  %1171 = vmatprep.mubr.bf16.mxu0 %v1224_v21 }
  0xfb   :  { %v1141_v29 = vpop.f32.mrb[16].mxu0 }
  0xfc   :  { %v297_v30 = vpop.f32.mrb[17].mxu0  ;;  %v378_v33 = vmax.f32 %v1141_v29, 0.0 }
  0xfd   :  { %v1142_v31 = vpop.f32.mrb[18].mxu0  ;;  %v376_v36 = vmax.f32 %v297_v30, 0.0  ;;  %v448_v30 = vpop.permute.xlu0 %447 }
  0xfe   :  { %v379_v34 = vmax.f32 %v1142_v31, 0.0  ;;  %v300_v35 = vpop.f32.mrb[19].mxu0 }
  0xff   :  { %v377_v37 = vmax.f32 %v300_v35, 0.0 }
 0x100   :  { %v401_v38 = vpack.c.bf16 %v379_v34, %v378_v33 }
 0x101   :  { %v400_v39 = vpack.c.bf16 %v377_v37, %v376_v36 }
 0x103   :  { %v1145_v40 = vpop.f32.mrb[20].mxu0  ;;  %1045 = vmatprep.subr.bf16.mxu1 %v400_v39 }
 0x104   :  { %v313_v41 = vpop.f32.mrb[21].mxu0  ;;  %1046 = vmatpush3.bf16.msra.mxu1 %v1435_v49  ;;  %v382_v43 = vmax.f32 %v1145_v40, 0.0 }
 0x105   :  { %v1146_v42 = vpop.f32.mrb[22].mxu0  ;;  %1047 = vmatprep.subr.bf16.mxu1 %v401_v38  ;;  %v380_v46 = vmax.f32 %v313_v41, 0.0 }
 0x106   :  { %v383_v44 = vmax.f32 %v1146_v42, 0.0  ;;  %v316_v45 = vpop.f32.mrb[23].mxu0 }
 0x107   :  { %v381_v47 = vmax.f32 %v316_v45, 0.0 }
 0x108   :  { %v403_v50 = vpack.c.bf16 %v383_v44, %v382_v43  ;;  %1048 = vmatpush3.bf16.msra.mxu1 %v1433_v48  ;;  %v458_v43 = vpop.permute.xlu1 %457 }
 0x109   :  { %v402_v51 = vpack.c.bf16 %v381_v47, %v380_v46 }
 0x10b   :  { %v1149_v52 = vpop.f32.mrb[24].mxu0  ;;  %1049 = vmatprep.subr.bf16.mxu1 %v402_v51 }
 0x10c   :  { %v329_v53 = vpop.f32.mrb[25].mxu0  ;;  %1050 = vmatpush3.bf16.msra.mxu1 %v1451_v63  ;;  %v386_v55 = vmax.f32 %v1149_v52, 0.0 }
 0x10d   :  { %v1150_v54 = vpop.f32.mrb[26].mxu0  ;;  %1051 = vmatprep.subr.bf16.mxu1 %v403_v50  ;;  %v384_v57 = vmax.f32 %v329_v53, 0.0 }
 0x10e   :  { %v387_v49 = vmax.f32 %v1150_v54, 0.0  ;;  %v332_v56 = vpop.f32.mrb[27].mxu0  ;;  %v463_v54 = vpop.permute.xlu0 %462 }
 0x10f   :  { %v385_v58 = vmax.f32 %v332_v56, 0.0 }
 0x110   :  { %v405_v59 = vpack.c.bf16 %v387_v49, %v386_v55  ;;  %1052 = vmatpush3.bf16.msra.mxu1 %v1449_v62  ;;  %v1200_v62 = vld [vmem:[%s1564_s2] ss:$8 sps:$4 sm:$0xff]  }
 0x111   :  { %v404_v60 = vpack.c.bf16 %v385_v58, %v384_v57  ;;  %v468_v57 = vpop.permute.xlu1 %467 }
 0x113   :  { %v1153_v61 = vpop.f32.mrb[28].mxu0  ;;  %1053 = vmatprep.subr.bf16.mxu1 %v404_v60 }
 0x114   :  { %v345_v48 = vpop.f32.mrb[29].mxu0  ;;  %1054 = vmatpush3.bf16.msra.mxu1 %v1467_v13  ;;  %v390_v1 = vmax.f32 %v1153_v61, 0.0  ;;  %v1212_v13 = vld [vmem:[%s1564_s2 + $0x44] ss:$8 sps:$4 sm:$0xff]  }
 0x115   :  { %v1154_v0 = vpop.f32.mrb[30].mxu0  ;;  %1055 = vmatprep.subr.bf16.mxu1 %v405_v59  ;;  %v388_v3 = vmax.f32 %v345_v48, 0.0 }
 0x116   :  { %v391_v63 = vmax.f32 %v1154_v0, 0.0  ;;  %v348_v2 = vpop.f32.mrb[31].mxu0 }
 0x117   :  { %v389_v4 = vmax.f32 %v348_v2, 0.0  ;;  %v473_v2 = vpop.permute.xlu0 %472 }
 0x118   :  { %v407_v5 = vpack.c.bf16 %v391_v63, %v390_v1  ;;  %1056 = vmatpush3.bf16.msra.mxu1 %v1465_v12  ;;  %v1211_v12 = vld [vmem:[%s1564_s2 + $0x30] ss:$8 sps:$4 sm:$0xff]  }
 0x119   :  { %v406_v6 = vpack.c.bf16 %v389_v4, %v388_v3 }
 0x11b   :  { %1057 = vmatprep.subr.bf16.mxu1 %v406_v6  ;;  %v478_v6 = vpop.permute.xlu1 %477 }
 0x11c   :  { %1058 = vmatpush3.bf16.msra.mxu1 %v398_v27 }
 0x11d   :  { %1059 = vmatprep.subr.bf16.mxu1 %v407_v5 }
 0x120   :  { %1060 = vmatpush3.bf16.msra.mxu1 %v1478_v26 }
 0x123   :  { %633 = vmatmul.mubr.bf16.vlgmr.msra.gmra.mrb[0].mxu1 %v1200_v62 }
 0x124   :  { %640 = vmatprep.mubr.bf16.mxu1 %v1203_v7 }
 0x12b   :  { %641 = vmatmul.mubr.bf16.gmra.mrb[4].mxu1 %v1205_v8 }
 0x12c   :  { %648 = vmatprep.mubr.bf16.mxu1 %v1206_v9 }
 0x133   :  { %649 = vmatmul.mubr.bf16.gmra.mrb[8].mxu1 %v1208_v10 }
 0x134   :  { %656 = vmatprep.mubr.bf16.mxu1 %v1209_v11 }
 0x13b   :  { %657 = vmatmul.mubr.bf16.gmra.mrb[12].mxu1 %v1211_v12 }
 0x13c   :  { %664 = vmatprep.mubr.bf16.mxu1 %v1212_v13 }
 0x143   :  { %665 = vmatmul.mubr.bf16.gmra.mrb[16].mxu1 %v1214_v14  ;;  %v483_v14 = vpop.permute.xlu0 %482 }
 0x144   :  { %672 = vmatprep.mubr.bf16.mxu1 %v1215_v15 }
 0x14b   :  { %673 = vmatmul.mubr.bf16.gmra.mrb[20].mxu1 %v1217_v16 }
 0x14c   :  { %680 = vmatprep.mubr.bf16.mxu1 %v1218_v17 }
 0x153   :  { %681 = vmatmul.mubr.bf16.gmra.mrb[24].mxu1 %v1220_v18  ;;  %v488_v18 = vpop.permute.xlu1 %487 }
 0x154   :  { %688 = vmatprep.mubr.bf16.mxu1 %v1221_v19 }
 0x15b   :  { %689 = vmatmul.mubr.bf16.gmra.mrb[28].mxu1 %v1223_v20 }
 0x1f6   :  { %v1061_v23 = vpop.f32.mrb[0].mxu1 }
 0x1f7   :  { %v1062_v24 = vpop.f32.mrb[1].mxu1 }
 0x1f8   :  { %v1063_v25 = vadd.f32 %v1062_v24, %v1061_v23  ;;  %v1064_v26 = vpop.f32.mrb[2].mxu1 }
 0x1f9   :  { %v1065_v27 = vpop.f32.mrb[3].mxu1 }
 0x1fa   :  { %v635_v28 = vadd.f32 %v1063_v25, %v443_v22  ;;  %v1066_v29 = vadd.f32 %v1065_v27, %v1064_v26  ;;  %v493_v27 = vpop.permute.xlu0 %492 }
 0x1fc   :  { %v638_v31 = vadd.f32 %v1066_v29, %v448_v30  ;;  %v697_v33 = vmax.f32 %v635_v28, 0.0 }
 0x1fe   :  { %v698_v34 = vmax.f32 %v638_v31, 0.0  ;;  %v1067_v35 = vpop.f32.mrb[4].mxu1  ;;  %v498_v31 = vpop.permute.xlu1 %497 }
 0x1ff   :  { %v1068_v36 = vpop.f32.mrb[5].mxu1 }
 0x200   :  { %v1069_v37 = vadd.f32 %v1068_v36, %v1067_v35  ;;  %v1070_v38 = vpop.f32.mrb[6].mxu1  ;;  %v713_v39 = vpack.c.bf16 %v698_v34, %v697_v33 }
 0x201   :  { %v1071_v40 = vpop.f32.mrb[7].mxu1 }
 0x202   :  { %v643_v41 = vadd.f32 %v1069_v37, %v453_v32  ;;  %v1072_v42 = vadd.f32 %v1071_v40, %v1070_v38  ;;  %1155 = vmatprep.subr.bf16.mxu0 %v713_v39  ;;  %v503_v40 = vpop.permute.xlu0 %502 }
 0x203   :  { %1156 = vmatpush3.bf16.msra.mxu0 %v713_v39 }
 0x204   :  { %v646_v44 = vadd.f32 %v1072_v42, %v458_v43  ;;  %v699_v45 = vmax.f32 %v643_v41, 0.0 }
 0x206   :  { %v700_v46 = vmax.f32 %v646_v44, 0.0  ;;  %v1073_v47 = vpop.f32.mrb[8].mxu1  ;;  %v508_v44 = vpop.permute.xlu1 %507 }
 0x207   :  { %v1074_v50 = vpop.f32.mrb[9].mxu1 }
 0x208   :  { %v1075_v51 = vadd.f32 %v1074_v50, %v1073_v47  ;;  %v1076_v52 = vpop.f32.mrb[10].mxu1  ;;  %v714_v53 = vpack.c.bf16 %v700_v46, %v699_v45 }
 0x209   :  { %v1077_v55 = vpop.f32.mrb[11].mxu1 }
 0x20a   :  { %v651_v49 = vadd.f32 %v1075_v51, %v463_v54  ;;  %v1078_v56 = vadd.f32 %v1077_v55, %v1076_v52  ;;  %1157 = vmatprep.subr.bf16.mxu0 %v714_v53  ;;  %v513_v55 = vpop.permute.xlu0 %512 }
 0x20b   :  { %1158 = vmatpush3.bf16.msra.mxu0 %v714_v53 }
 0x20c   :  { %v654_v58 = vadd.f32 %v1078_v56, %v468_v57  ;;  %v701_v59 = vmax.f32 %v651_v49, 0.0 }
 0x20e   :  { %v702_v60 = vmax.f32 %v654_v58, 0.0  ;;  %v1079_v61 = vpop.f32.mrb[12].mxu1  ;;  %v518_v58 = vpop.permute.xlu1 %517 }
 0x20f   :  { %v1080_v48 = vpop.f32.mrb[13].mxu1 }
 0x210   :  { %v1081_v0 = vadd.f32 %v1080_v48, %v1079_v61  ;;  %v1082_v1 = vpop.f32.mrb[14].mxu1  ;;  %v715_v63 = vpack.c.bf16 %v702_v60, %v701_v59 }
 0x211   :  { %v1083_v3 = vpop.f32.mrb[15].mxu1 }
 0x212   :  { %v659_v4 = vadd.f32 %v1081_v0, %v473_v2  ;;  %v1084_v5 = vadd.f32 %v1083_v3, %v1082_v1  ;;  %1159 = vmatprep.subr.bf16.mxu0 %v715_v63  ;;  %v1225_v0 = vld [vmem:[%s1566_s4 + $0x8] sm:$0xff]   ;;  %v1226_v1 = vld [vmem:[%s1566_s4 + $0x10] sm:$0xff]   ;;  %v740_v2 = vpop.permute.xlu0 %739  ;;  %v745_v3 = vpop.permute.xlu1 %744 }
 0x213   :  { %1160 = vmatpush3.bf16.msra.mxu0 %v715_v63  ;;  %v1227_v63 = vld [vmem:[%s1566_s4 + $0x18] sm:$0xff]   ;;  %s1257_s4 = smov [#allocation3]  }
 0x214   :  { %v662_v62 = vadd.f32 %v1084_v5, %v478_v6  ;;  %v703_v7 = vmax.f32 %v659_v4, 0.0  ;;  %s967_s7 = sshll.u32 %s1257_s4, 4  ;;  %s968_s7 = int_to_ptr.vmem [resolvable:$true] %s967_s7 }
 0x215   :  { %s1232_s13 = scalar_lea.vmem %s968_s7, 16  ;;  %s1236_s0 = scalar_lea.vmem %s968_s7, 32 }
 0x216   :  { %v704_v8 = vmax.f32 %v662_v62, 0.0  ;;  %v1085_v9 = vpop.f32.mrb[16].mxu1  ;;  %v750_v4 = vpop.permute.xlu0 %749  ;;  %p1233_p0 = scmp.ne.s32.totalorder %s968_s7, %s1232_s13  ;;  %p1237_p1 = scmp.lt.s32.totalorder %s968_s7, %s968_s7 }
 0x217   :  { %v1086_v10 = vpop.f32.mrb[17].mxu1  ;;  %v755_v5 = vpop.permute.xlu1 %754  ;;  %p1238_p2 = scmp.lt.s32.totalorder %s1236_s0, %s1232_s13 }
 0x218   :  { %v1087_v11 = vadd.f32 %v1086_v10, %v1085_v9  ;;  %v1088_v12 = vpop.f32.mrb[18].mxu1  ;;  %v716_v13 = vpack.c.bf16 %v704_v8, %v703_v7 }
 0x219   :  { %v1089_v15 = vpop.f32.mrb[19].mxu1  ;;  %p1239_p3 = por %p1238_p2, %p1237_p1 }
 0x21a   :  { %v667_v16 = vadd.f32 %v1087_v11, %v483_v14  ;;  %v1090_v17 = vadd.f32 %v1089_v15, %v1088_v12  ;;  %1161 = vmatprep.subr.bf16.mxu0 %v716_v13  ;;  %v885_v6 = vpop.permute.xlu0 %884 }
 0x21b   :  { %1162 = vmatpush3.bf16.msra.mxu0 %v716_v13  ;;  %v890_v62 = vpop.permute.xlu1 %889  ;;  %p1240_p4 = pnand %p1239_p3, %p1233_p0 }
 0x21c   :  { %v670_v19 = vadd.f32 %v1090_v17, %v488_v18  ;;  %v705_v20 = vmax.f32 %v667_v16, 0.0 }
 0x21e   :  { %v706_v21 = vmax.f32 %v670_v19, 0.0  ;;  %v1091_v22 = vpop.f32.mrb[20].mxu1  ;;  %v760_v7 = vpop.permute.xlu0 %759 }
 0x21f   :  { %v1092_v23 = vpop.f32.mrb[21].mxu1  ;;  %v895_v8 = vpop.permute.xlu1 %894 }
 0x220   :  { %v1093_v24 = vadd.f32 %v1092_v23, %v1091_v22  ;;  %v1094_v25 = vpop.f32.mrb[22].mxu1  ;;  %v717_v26 = vpack.c.bf16 %v706_v21, %v705_v20 }
 0x221   :  { %v1095_v28 = vpop.f32.mrb[23].mxu1 }
 0x222   :  { %v675_v29 = vadd.f32 %v1093_v24, %v493_v27  ;;  %v1096_v30 = vadd.f32 %v1095_v28, %v1094_v25  ;;  %1163 = vmatprep.subr.bf16.mxu0 %v717_v26  ;;  %v765_v9 = vpop.permute.xlu0 %764 }
 0x223   :  { %1164 = vmatpush3.bf16.msra.mxu0 %v717_v26  ;;  %v900_v11 = vpop.permute.xlu1 %899 }
 0x224   :  { %v678_v32 = vadd.f32 %v1096_v30, %v498_v31  ;;  %v707_v33 = vmax.f32 %v675_v29, 0.0 }
 0x226   :  { %v708_v34 = vmax.f32 %v678_v32, 0.0  ;;  %v1097_v35 = vpop.f32.mrb[24].mxu1  ;;  %v770_v20 = vpop.permute.xlu0 %769 }
 0x227   :  { %v1098_v36 = vpop.f32.mrb[25].mxu1  ;;  %v905_v23 = vpop.permute.xlu1 %904 }
 0x228   :  { %v1099_v37 = vadd.f32 %v1098_v36, %v1097_v35  ;;  %v1100_v38 = vpop.f32.mrb[26].mxu1  ;;  %v718_v39 = vpack.c.bf16 %v708_v34, %v707_v33 }
 0x229   :  { %v1101_v41 = vpop.f32.mrb[27].mxu1 }
 0x22a   :  { %v683_v42 = vadd.f32 %v1099_v37, %v503_v40  ;;  %v1102_v43 = vadd.f32 %v1101_v41, %v1100_v38  ;;  %1165 = vmatprep.subr.bf16.mxu0 %v718_v39  ;;  %v775_v34 = vpop.permute.xlu0 %774 }
 0x22b   :  { %1166 = vmatpush3.bf16.msra.mxu0 %v718_v39  ;;  %v910_v41 = vpop.permute.xlu1 %909 }
 0x22c   :  { %v686_v45 = vadd.f32 %v1102_v43, %v508_v44  ;;  %v709_v46 = vmax.f32 %v683_v42, 0.0 }
 0x22e   :  { %v710_v47 = vmax.f32 %v686_v45, 0.0  ;;  %v1103_v50 = vpop.f32.mrb[28].mxu1 }
 0x22f   :  { %v1104_v51 = vpop.f32.mrb[29].mxu1 }
 0x230   :  { %v1105_v52 = vadd.f32 %v1104_v51, %v1103_v50  ;;  %v1106_v53 = vpop.f32.mrb[30].mxu1  ;;  %v719_v54 = vpack.c.bf16 %v710_v47, %v709_v46  ;;  %v915_v51 = vpop.permute.xlu0 %914 }
 0x231   :  { %v1107_v49 = vpop.f32.mrb[31].mxu1 }
 0x232   :  { %v691_v56 = vadd.f32 %v1105_v52, %v513_v55  ;;  %v1108_v57 = vadd.f32 %v1107_v49, %v1106_v53  ;;  %1167 = vmatprep.subr.bf16.mxu0 %v719_v54 }
 0x233   :  { %1168 = vmatpush3.bf16.msra.mxu0 %v719_v54  ;;  %v920_v54 = vpop.permute.xlu1 %919 }
 0x234   :  { %v694_v59 = vadd.f32 %v1108_v57, %v518_v58  ;;  %v711_v60 = vmax.f32 %v691_v56, 0.0  ;;  %v949_v56 = vlaneseq }
 0x236   :  { %v712_v61 = vmax.f32 %v694_v59, 0.0  ;;  %v950_v59 = vshrl.u32 %v949_v56, 7 }
 0x238   :  { %v720_v48 = vpack.c.bf16 %v712_v61, %v711_v60 }
 0x23a   :  { %1169 = vmatprep.subr.bf16.mxu0 %v720_v48 }
 0x23b   :  { %1170 = vmatpush3.bf16.msra.mxu0 %v720_v48  ;;  %v951_v48 = vsub.s32 0, %v950_v59 }
 0x23e   :  { %1172 = vmatmul.mubr.bf16.vlgmr.msra.gmra.mrb[32].mxu0 %v1225_v0 }
 0x23f   :  { %1175 = vmatprep.mubr.bf16.mxu0 %v1226_v1  ;;  %v947_v1 = vpop.permute.xlu0 %946 }
 0x246   :  { %1176 = vmatmul.mubr.bf16.gmra.mrb[36].mxu0 %v1227_v63 }
 0x311   :  { %v1173_v10 = vpop.f32.mrb[32].mxu0 }
 0x312   :  { %v835_v12 = vpop.f32.mrb[33].mxu0  ;;  %v844_v13 = vadd.f32 %v1173_v10, %v750_v4 }
 0x313   :  { %v836_v14 = vadd.f32 %v835_v12, %v740_v2  ;;  %v1174_v15 = vpop.f32.mrb[34].mxu0  ;;  %v952_v2 = vrot.slane %v947_v1, %v951_v48 }
 0x314   :  { %v847_v16 = vadd.f32 %v1174_v15, %v755_v5  ;;  %v838_v17 = vpop.f32.mrb[35].mxu0  ;;  %v868_v21 = vmax.f32 %v844_v13, 0.0 }
 0x315   :  { %v866_v18 = vmax.f32 %v836_v14, 0.0  ;;  %v839_v19 = vadd.f32 %v838_v17, %v745_v3 }
 0x316   :  { %v869_v24 = vmax.f32 %v847_v16, 0.0  ;;  %v924_v29 = vmul.f32 %v895_v8, %v868_v21 }
 0x317   :  { %v867_v22 = vmax.f32 %v839_v19, 0.0  ;;  %v922_v25 = vmul.f32 %v885_v6, %v866_v18 }
 0x318   :  { %v925_v35 = vmul.f32 %v900_v11, %v869_v24 }
 0x319   :  { %v923_v26 = vmul.f32 %v890_v62, %v867_v22  ;;  %v1177_v27 = vpop.f32.mrb[36].mxu0 }
 0x31a   :  { %v851_v28 = vpop.f32.mrb[37].mxu0  ;;  %v860_v31 = vadd.f32 %v1177_v27, %v770_v20 }
 0x31b   :  { %v930_v30 = vadd.f32 %v923_v26, %v922_v25  ;;  %v852_v32 = vadd.f32 %v851_v28, %v760_v7  ;;  %v1178_v33 = vpop.f32.mrb[38].mxu0 }
 0x31c   :  { %v854_v36 = vpop.f32.mrb[39].mxu0  ;;  %v863_v39 = vadd.f32 %v1178_v33, %v775_v34  ;;  %v872_v42 = vmax.f32 %v860_v31, 0.0 }
 0x31d   :  { %v931_v37 = vadd.f32 %v930_v30, %v924_v29  ;;  %v870_v38 = vmax.f32 %v852_v32, 0.0  ;;  %v855_v40 = vadd.f32 %v854_v36, %v765_v9 }
 0x31e   :  { %v873_v47 = vmax.f32 %v863_v39, 0.0  ;;  %v928_v52 = vmul.f32 %v915_v51, %v872_v42 }
 0x31f   :  { %v926_v43 = vmul.f32 %v905_v23, %v870_v38  ;;  %v932_v44 = vadd.f32 %v931_v37, %v925_v35  ;;  %v871_v45 = vmax.f32 %v855_v40, 0.0 }
 0x320   :  { %v929_v55 = vmul.f32 %v920_v54, %v873_v47 }
 0x321   :  { %v933_v46 = vadd.f32 %v932_v44, %v926_v43  ;;  %v927_v50 = vmul.f32 %v910_v41, %v871_v45 }
 0x323   :  { %v934_v53 = vadd.f32 %v933_v46, %v927_v50 }
 0x325   :  { %v935_v49 = vadd.f32 %v934_v53, %v928_v52 }
 0x327   :  { %v936_v57 = vadd.f32 %v935_v49, %v929_v55 }
 0x329   :  { %v937_v58 = vrot.slane %v936_v57, 4 }
 0x32b   :  { %v938_v60 = vadd.f32 %v937_v58, %v936_v57 }
 0x32d   :  { %v939_v61 = vrot.slane %v938_v60, 2 }
 0x32f   :  { %v940_v0 = vadd.f32 %v939_v61, %v938_v60 }
 0x331   :  { %v941_v63 = vrot.slane %v940_v0, 1 }
 0x333   :  { %v942_v3 = vadd.f32 %v941_v63, %v940_v0 }
 0x335   :  { %v953_v4 = vadd.f32 %v952_v2, %v942_v3 }
 0x337   :  { %v1027_v5 = vmul.f32 -1.442695, %v953_v4 }
 0x339   :  { %1228 = vpow2.f32 %v1027_v5 }
 0x343   :  { %v1229_v6 = vpop.eup %1228 }
 0x344   :  { %v957_v62 = vadd.f32 1.0, %v1229_v6 }
 0x346   :  { %1230 = vrcp.f32 %v957_v62 }
 0x350   :  { %v1231_v7 = vpop.eup %1230 }
 0x351   :  { %960 = vst [vmem:[#allocation3] sm:$0x1] %v1231_v7 }
 0x352   :  { %1243 = shalt.err (!%p1240_p4)
}
 0x353   :  { %s1244_s16 = scalar_lea.hbm %s1570_s8, 16 }
 0x354   :  { %p1245_p5 = scmp.ne.s32.totalorder %s1570_s8, %s1244_s16  ;;  %p1248_p6 = scmp.lt.u32.totalorder %s1244_s16, %s1570_s8 }
 0x356   :  { %p1250_p7 = pnand %p1248_p6, %p1245_p5 }
 0x358   :  { %1253 = shalt.err (!%p1250_p7)
}
 0x359   :  { %970 = dma.vmem_to_hbm [thread:$0]  %s968_s7, 16, %s1570_s8, [#allocation4]  }
 0x35a   :  { %1254 = dma.done.wait [#allocation4], 16  }
 0x35b   :  { %1255 = vsyncadd [#allocation4], 4294967280 }
 0x35c   :  { %974 = vsyncpa [#allocation4], 1 }

</bundles_post_ra>
